<compile_context>
chip_gen: v7x
topology: tpu7x:2x2x1
jax: 0.10.0
libtpu: 0.0.40
codegen_flags: <defaults>
</compile_context>

<pallas_src>
from functools import partial

import jax
import jax.numpy as jnp
from jax import lax
from jax.experimental import pallas as pl
from jax.experimental.pallas import tpu as pltpu

DROPOUT_P = 0.2
KEEP_SCALE = 1.0 / (1.0 - DROPOUT_P)
# keep iff hash_bits (uniform in [0, 2^31)) >= p * 2^31
DROP_THRESHOLD_31 = int(round(DROPOUT_P * (1 << 31)))
N_EMBD = 4
BLOCK_SIZE = 8


def _round_up(x: int, m: int) -> int:
    return ((x + m - 1) // m) * m


def _i32(v: int) -> int:
    """Wrap an unsigned 32-bit constant into int32 two's-complement range."""
    v &= 0xFFFFFFFF
    return v - (1 << 32) if v >= (1 << 31) else v


def _dropout_keep_bits(shape, seed_i32, row_start):
    """Counter-based uniform bits in [0, 2^31) from (seed, row, col).

    Pure int32 VPU arithmetic (mul/xor/logical-shift) so it lowers on both
    Mosaic and the interpret backend.  murmur3-style finalizer mixing.
    """
    rows = lax.broadcasted_iota(jnp.int32, shape, 0) + row_start
    cols = lax.broadcasted_iota(jnp.int32, shape, 1)
    h = (seed_i32
         + rows * jnp.int32(_i32(0x9E3779B1))
         + cols * jnp.int32(_i32(0x85EBCA77)))
    h = h ^ lax.shift_right_logical(h, 16)
    h = h * jnp.int32(_i32(0x85EBCA6B))
    h = h ^ lax.shift_right_logical(h, 13)
    h = h * jnp.int32(_i32(0xC2B2AE35))
    h = h ^ lax.shift_right_logical(h, 16)
    return h & jnp.int32(0x7FFFFFFF)


def _ffn_kernel(seed_ref, x_ref, w1_ref, b1_ref, w2_ref, b2_ref, o_ref,
                *, training: bool, row_tile: int):
    # bf16 inputs to the MXU, f32 accumulation.
    x = x_ref[...].astype(jnp.bfloat16)
    w1 = w1_ref[...].astype(jnp.bfloat16)
    w2 = w2_ref[...].astype(jnp.bfloat16)
    b1 = b1_ref[...]          # (1, Hp) f32, read once
    b2 = b2_ref[...]          # (1, Cp) f32, read once

    # Linear 1 + ReLU
    h = jnp.dot(x, w1, preferred_element_type=jnp.float32) + b1
    h = jnp.maximum(h, 0.0)

    # Linear 2
    y = jnp.dot(h.astype(jnp.bfloat16), w2,
                preferred_element_type=jnp.float32) + b2

    if training:
        # Inverted dropout: zero w.p. p, scale kept values by 1/(1-p).
        # Global row offset keys the hash so every grid tile gets a distinct
        # mask from the same seed.
        row_start = pl.program_id(0) * row_tile
        bits = _dropout_keep_bits(y.shape, seed_ref[0], row_start)
        keep = bits >= jnp.int32(DROP_THRESHOLD_31)
        y = jnp.where(keep, y * KEEP_SCALE, 0.0)

    o_ref[...] = y.astype(o_ref.dtype)


def feed_forward(x, params, *, training: bool = False, seed: int = 0,
                 row_tile: int = 256):
    """x: (B, T, C) float32 -> (B, T, C) float32."""
    w1, b1, w2, b2 = params
    B, T, C = x.shape
    H = w1.shape[1]
    N = B * T

    # Lane-dense padding of feature dims; row tiling of the token dim.
    C_pad = _round_up(C, 128)
    H_pad = _round_up(H, 128)
    TM = min(row_tile, _round_up(N, 8))
    N_pad = _round_up(N, TM)
    grid_m = N_pad // TM

    f32 = jnp.float32
    x2 = jnp.zeros((N_pad, C_pad), x.dtype).at[:N, :C].set(x.reshape(N, C))
    w1p = jnp.zeros((C_pad, H_pad), f32).at[:C, :H].set(w1.astype(f32))
    b1p = jnp.zeros((1, H_pad), f32).at[0, :H].set(b1.astype(f32))
    w2p = jnp.zeros((H_pad, C_pad), f32).at[:H, :C].set(w2.astype(f32))
    b2p = jnp.zeros((1, C_pad), f32).at[0, :C].set(b2.astype(f32))
    seed_arr = jnp.array([seed], dtype=jnp.int32)

    # VMEM budget (sized against v7x's 64 MiB physical / 32 MiB default-scoped
    # VMEM): double-buffered x/out tiles, resident weights/biases, hidden tile.
    vmem_need = (
        2 * TM * C_pad * 4            # x tiles (double-buffered)
        + 2 * TM * C_pad * 4          # out tiles (double-buffered)
        + 2 * C_pad * H_pad * 4       # W1 + W2 resident (f32)
        + (H_pad + C_pad) * 4         # biases
        + 3 * TM * H_pad * 4          # hidden intermediate + bf16 copies
    )
    vmem_limit = int(min(max(2 * vmem_need, 8 * (1 << 20)), 48 * (1 << 20)))

    cost = pl.CostEstimate(
        flops=4 * N_pad * C_pad * H_pad,   # two matmuls
        transcendentals=0,
        bytes_accessed=4 * (N_pad * C_pad * 2 + C_pad * H_pad * 2
                            + H_pad + C_pad),
    )

    out2 = pl.pallas_call(
        partial(_ffn_kernel, training=training, row_tile=TM),
        out_shape=jax.ShapeDtypeStruct((N_pad, C_pad), x.dtype),
        grid_spec=pltpu.PrefetchScalarGridSpec(
            num_scalar_prefetch=1,            # seed lands in SMEM
            grid=(grid_m,),
            in_specs=[
                pl.BlockSpec((TM, C_pad), lambda i, seed: (i, 0)),     # x tile
                pl.BlockSpec((C_pad, H_pad), lambda i, seed: (0, 0)),  # W1
                pl.BlockSpec((1, H_pad), lambda i, seed: (0, 0)),      # b1
                pl.BlockSpec((H_pad, C_pad), lambda i, seed: (0, 0)),  # W2
                pl.BlockSpec((1, C_pad), lambda i, seed: (0, 0)),      # b2
            ],
            out_specs=pl.BlockSpec((TM, C_pad), lambda i, seed: (i, 0)),
        ),
        compiler_params=pltpu.CompilerParams(
            dimension_semantics=("parallel",),   # shards tiles across cores
            vmem_limit_bytes=vmem_limit,
        ),
        cost_estimate=cost,
    )(seed_arr, x2, w1p, b1p, w2p, b2p)

    return out2[:N, :C].reshape(B, T, C)


def init_params(key, n_embd):
    """Deterministic init mirroring torch.nn.Linear defaults
    (uniform(-1/sqrt(fan_in), 1/sqrt(fan_in)) for weight and bias)."""
    h = 4 * n_embd
    k1, k2, k3, k4 = jax.random.split(key, 4)
    bound1 = 1.0 / jnp.sqrt(n_embd)
    bound2 = 1.0 / jnp.sqrt(h)
    w1 = jax.random.uniform(k1, (n_embd, h), jnp.float32, -bound1, bound1)
    b1 = jax.random.uniform(k2, (h,), jnp.float32, -bound1, bound1)
    w2 = jax.random.uniform(k3, (h, n_embd), jnp.float32, -bound2, bound2)
    b2 = jax.random.uniform(k4, (n_embd,), jnp.float32, -bound2, bound2)
    return (w1, b1, w2, b2)


def feed_forward_ref(x, params):
    """Pure-JAX f32 reference (eval mode: dropout is identity)."""
    w1, b1, w2, b2 = params
    h = jnp.maximum(x @ w1 + b1, 0.0)
    return h @ w2 + b2


if __name__ == "__main__":
    key = jax.random.PRNGKey(0)
    kx, kp = jax.random.split(key)

    B, T, C = 2, BLOCK_SIZE, N_EMBD      # shapes implied by the model config
    x = jax.random.normal(kx, (B, T, C), jnp.float32)
    params = init_params(kp, C)

    # Eval-mode forward (deterministic; dropout is identity as in model.eval()).
    y = feed_forward(x, params, training=False)
    y = jax.block_until_ready(y)

    y_ref = feed_forward_ref(x, params)
    assert y.shape == (B, T, C)
    # bf16 matmul inputs with f32 accumulation -> relaxed tolerance vs f32 ref.
    assert jnp.allclose(y, y_ref, atol=2e-2, rtol=2e-2), "mismatch vs reference"

    # Training-mode forward: exercise the dropout path. Kept values must equal
    # eval values scaled by 1/(1-p); dropped values are exactly zero.
    yt = feed_forward(x, params, training=True, seed=123)
    yt = jax.block_until_ready(yt)
    assert yt.shape == (B, T, C)
    kept = yt != 0.0
    assert jnp.allclose(jnp.where(kept, yt, 0.0),
                        jnp.where(kept, y * KEEP_SCALE, 0.0),
                        atol=2e-2, rtol=2e-2), "dropout scaling mismatch"

    # TODO(synk): training-mode dropout uses a counter-based in-kernel hash, so
    # its mask does not bit-match torch's RNG stream (semantics match: zero
    # w.p. 0.2, scale kept values by 1/0.8).
    print("KERNEL_OK")
</pallas_src>

<mosaic_0001>
module attributes {stable_mosaic.version = 11 : i64} {
  func.func @_ffn_kernel(%arg0: i32, %arg1: memref<1xi32, #tpu.memory_space<smem>>, %arg2: memref<16x128xf32, #tpu.memory_space<vmem>>, %arg3: memref<128x128xf32, #tpu.memory_space<vmem>>, %arg4: memref<1x128xf32, #tpu.memory_space<vmem>>, %arg5: memref<128x128xf32, #tpu.memory_space<vmem>>, %arg6: memref<1x128xf32, #tpu.memory_space<vmem>>, %arg7: memref<16x128xf32, #tpu.memory_space<vmem>>) attributes {dimension_semantics = [#tpu.dimension_semantics<parallel>], iteration_bounds = array<i64: 1>, scalar_prefetch = 1 : i64, scratch_operands = 0 : i64, tpu.core_type = #tpu.core_type<tc>, window_params = [{transform_indices = @transform_0, window_bounds = array<i64: 16, 128>}, {pipeline_mode = #tpu.pipeline_mode<synchronous>, transform_indices = @transform_1, window_bounds = array<i64: 128, 128>}, {pipeline_mode = #tpu.pipeline_mode<synchronous>, transform_indices = @transform_2, window_bounds = array<i64: 1, 128>}, {pipeline_mode = #tpu.pipeline_mode<synchronous>, transform_indices = @transform_3, window_bounds = array<i64: 128, 128>}, {pipeline_mode = #tpu.pipeline_mode<synchronous>, transform_indices = @transform_4, window_bounds = array<i64: 1, 128>}, {transform_indices = @transform_5, window_bounds = array<i64: 16, 128>}]} {
    %c0 = arith.constant 0 : index
    %c0_0 = arith.constant 0 : index
    %0 = vector.load %arg2[%c0, %c0_0] : memref<16x128xf32, #tpu.memory_space<vmem>>, vector<16x128xf32>
    %1 = arith.truncf %0 : vector<16x128xf32> to vector<16x128xbf16>
    %c0_1 = arith.constant 0 : index
    %c0_2 = arith.constant 0 : index
    %2 = vector.load %arg3[%c0_1, %c0_2] : memref<128x128xf32, #tpu.memory_space<vmem>>, vector<128x128xf32>
    %3 = arith.truncf %2 : vector<128x128xf32> to vector<128x128xbf16>
    %c0_3 = arith.constant 0 : index
    %c0_4 = arith.constant 0 : index
    %4 = vector.load %arg5[%c0_3, %c0_4] : memref<128x128xf32, #tpu.memory_space<vmem>>, vector<128x128xf32>
    %5 = arith.truncf %4 : vector<128x128xf32> to vector<128x128xbf16>
    %c0_5 = arith.constant 0 : index
    %c0_6 = arith.constant 0 : index
    %6 = vector.load %arg4[%c0_5, %c0_6] : memref<1x128xf32, #tpu.memory_space<vmem>>, vector<1x128xf32>
    %c0_7 = arith.constant 0 : index
    %c0_8 = arith.constant 0 : index
    %7 = vector.load %arg6[%c0_7, %c0_8] : memref<1x128xf32, #tpu.memory_space<vmem>>, vector<1x128xf32>
    %cst = arith.constant dense<0.000000e+00> : vector<16x128xf32>
    %8 = tpu.matmul %1, %3, %cst {dimension_numbers = #tpu.dot_dimension_numbers<[1], [0], [0], [1], [0, 0, 1, 1], [], []>} : vector<16x128xbf16>, vector<128x128xbf16>, vector<16x128xf32> -> vector<16x128xf32>
    %9 = vector.broadcast %6 : vector<1x128xf32> to vector<16x128xf32>
    %10 = arith.addf %8, %9 : vector<16x128xf32>
    %cst_9 = arith.constant 0.000000e+00 : f32
    %11 = vector.broadcast %cst_9 : f32 to vector<16x128xf32>
    %12 = arith.maximumf %10, %11 : vector<16x128xf32>
    %13 = arith.truncf %12 : vector<16x128xf32> to vector<16x128xbf16>
    %cst_10 = arith.constant dense<0.000000e+00> : vector<16x128xf32>
    %14 = tpu.matmul %13, %5, %cst_10 {dimension_numbers = #tpu.dot_dimension_numbers<[1], [0], [0], [1], [0, 0, 1, 1], [], []>} : vector<16x128xbf16>, vector<128x128xbf16>, vector<16x128xf32> -> vector<16x128xf32>
    %15 = vector.broadcast %7 : vector<1x128xf32> to vector<16x128xf32>
    %16 = arith.addf %14, %15 : vector<16x128xf32>
    %c0_11 = arith.constant 0 : index
    %c0_12 = arith.constant 0 : index
    %17 = vector.load %arg7[%c0_11, %c0_12] : memref<16x128xf32, #tpu.memory_space<vmem>>, vector<16x128xf32>
    tpu.vector_store %arg7[%c0_11, %c0_12], %16 {strides = array<i32>} : memref<16x128xf32, #tpu.memory_space<vmem>>, vector<16x128xf32>,
    return
  }
  func.func @transform_0(%arg0: i32, %arg1: memref<1xi32, #tpu.memory_space<smem>>) -> (i32, i32) {
    %c0_i32 = arith.constant 0 : i32
    %c0_i32_0 = arith.constant 0 : i32
    return %arg0, %c0_i32 : i32, i32
  }
  func.func @transform_1(%arg0: i32, %arg1: memref<1xi32, #tpu.memory_space<smem>>) -> (i32, i32) {
    %c0_i32 = arith.constant 0 : i32
    %c0_i32_0 = arith.constant 0 : i32
    %c0_i32_1 = arith.constant 0 : i32
    return %c0_i32, %c0_i32_0 : i32, i32
  }
  func.func @transform_2(%arg0: i32, %arg1: memref<1xi32, #tpu.memory_space<smem>>) -> (i32, i32) {
    %c0_i32 = arith.constant 0 : i32
    %c0_i32_0 = arith.constant 0 : i32
    %c0_i32_1 = arith.constant 0 : i32
    return %c0_i32, %c0_i32_0 : i32, i32
  }
  func.func @transform_3(%arg0: i32, %arg1: memref<1xi32, #tpu.memory_space<smem>>) -> (i32, i32) {
    %c0_i32 = arith.constant 0 : i32
    %c0_i32_0 = arith.constant 0 : i32
    %c0_i32_1 = arith.constant 0 : i32
    return %c0_i32, %c0_i32_0 : i32, i32
  }
  func.func @transform_4(%arg0: i32, %arg1: memref<1xi32, #tpu.memory_space<smem>>) -> (i32, i32) {
    %c0_i32 = arith.constant 0 : i32
    %c0_i32_0 = arith.constant 0 : i32
    %c0_i32_1 = arith.constant 0 : i32
    return %c0_i32, %c0_i32_0 : i32, i32
  }
  func.func @transform_5(%arg0: i32, %arg1: memref<1xi32, #tpu.memory_space<smem>>) -> (i32, i32) {
    %c0_i32 = arith.constant 0 : i32
    %c0_i32_0 = arith.constant 0 : i32
    return %arg0, %c0_i32 : i32, i32
  }
}

</mosaic_0001>

<bundles_post_ra>
// kernel: tpu_custom_call.1
= control target key start
LH: loop header
LB: loop body
LE: loop exit
PB: predicated region body
PF: predicated region fallthrough
CT: control target
= control target key end

     0   :  { %12 = vsyncpa [#allocation5], 0  ;;  %s531_s0 = inlined_call_operand.<no memory space> [shape: s32[1], index: 0, kind: input, shape index: {}]   ;;  %s532_s1 = inlined_call_operand.hbm [shape: f32[16,128], index: 1, kind: input, shape index: {}]   ;;  %s533_s2 = inlined_call_operand.hbm [shape: f32[128,128], index: 2, kind: input, shape index: {}]   ;;  %s534_s3 = inlined_call_operand.vmem [shape: f32[1,128], index: 3, kind: input, shape index: {}]   ;;  %s535_s4 = inlined_call_operand.hbm [shape: f32[128,128], index: 4, kind: input, shape index: {}]   ;;  %s536_s5 = inlined_call_operand.vmem [shape: f32[1,128], index: 5, kind: input, shape index: {}]   ;;  %s537_s6 = inlined_call_operand.hbm [shape: f32[16,128], index: 6, kind: output, shape index: {}]  }
   0x1   :  { %13 = vsyncpa [#allocation8], 0 }
   0x2   :  { %14 = vsyncpa [#allocation6], 0  ;;  %s397_s0 = smov [#allocation7]   ;;  %s398_s22 = smov [#allocation4]  }
   0x3   :  { %s32_s21 = sshll.u32 %s397_s0, 4  ;;  %s20_s23 = sshll.u32 %s398_s22, 4  ;;  %s33_s21 = int_to_ptr.vmem [resolvable:$true] %s32_s21  ;;  %s440_s23 = int_to_ptr.vmem [resolvable:$true] %s20_s23 }
   0x4   :  { %s303_s26 = scalar_lea.hbm %s533_s2, 2048 }
   0x5   :  { %p304_p0 = scmp.ne.s32.totalorder %s533_s2, %s303_s26  ;;  %p307_p1 = scmp.lt.u32.totalorder %s303_s26, %s533_s2 }
   0x7   :  { %p309_p2 = pnand %p307_p1, %p304_p0 }
   0x9   :  { %312 = shalt.err (!%p309_p2)
}
   0xa   :  { %s313_s7 = scalar_lea.vmem %s33_s21, 2048  ;;  %p318_p4 = scmp.lt.s32.totalorder %s33_s21, %s33_s21 }
   0xb   :  { %p314_p3 = scmp.ne.s32.totalorder %s33_s21, %s313_s7  ;;  %p319_p5 = scmp.lt.s32.totalorder %s313_s7, %s313_s7 }
   0xd   :  { %p320_p6 = por %p319_p5, %p318_p4 }
   0xf   :  { %p321_p7 = pnand %p320_p6, %p314_p3 }
  0x11   :  { %324 = shalt.err (!%p321_p7)
}
  0x12   :  { %s399_s8 = smov 128   ;;  %s400_s9 = smov 8  }
  0x13   :  { %38 = dma.hbm_to_vmem [thread:$0]  %s533_s2, 2048, %s33_s21, [#allocation8], %s399_s8, %s399_s8, %s400_s9  }
  0x14   :  { %s325_s14 = scalar_lea.hbm %s532_s1, 256 }
  0x15   :  { %p326_p8 = scmp.ne.s32.totalorder %s532_s1, %s325_s14  ;;  %p329_p9 = scmp.lt.u32.totalorder %s325_s14, %s532_s1 }
  0x17   :  { %p331_p10 = pnand %p329_p9, %p326_p8 }
  0x19   :  { %334 = shalt.err (!%p331_p10)
}
  0x1a   :  { %s335_s19 = scalar_lea.vmem %s440_s23, 256  ;;  %p340_p12 = scmp.lt.s32.totalorder %s440_s23, %s440_s23 }
  0x1b   :  { %p336_p11 = scmp.ne.s32.totalorder %s440_s23, %s335_s19  ;;  %p341_p13 = scmp.lt.s32.totalorder %s335_s19, %s335_s19 }
  0x1d   :  { %p342_p0 = por %p341_p13, %p340_p12 }
  0x1f   :  { %p343_p1 = pnand %p342_p0, %p336_p11 }
  0x21   :  { %346 = shalt.err (!%p343_p1)
}
  0x22   :  { %26 = dma.hbm_to_vmem [thread:$0]  %s532_s1, 256, %s440_s23, [#allocation5], %s399_s8, %s399_s8, %s400_s9  }
  0x23   :  { %s401_s0 = smov [#allocation9]   ;;  %s347_s25 = scalar_lea.hbm %s535_s4, 2048 }
  0x24   :  { %s46_s21 = sshll.u32 %s401_s0, 4  ;;  %p348_p2 = scmp.ne.s32.totalorder %s535_s4, %s347_s25  ;;  %s47_s21 = int_to_ptr.vmem [resolvable:$true] %s46_s21 }
  0x25   :  { %p351_p3 = scmp.lt.u32.totalorder %s347_s25, %s535_s4 }
  0x27   :  { %p353_p4 = pnand %p351_p3, %p348_p2 }
  0x29   :  { %356 = shalt.err (!%p353_p4)
}
  0x2a   :  { %s357_s30 = scalar_lea.vmem %s47_s21, 2048  ;;  %p362_p6 = scmp.lt.s32.totalorder %s47_s21, %s47_s21 }
  0x2b   :  { %p358_p5 = scmp.ne.s32.totalorder %s47_s21, %s357_s30  ;;  %p363_p7 = scmp.lt.s32.totalorder %s357_s30, %s357_s30 }
  0x2d   :  { %p364_p8 = por %p363_p7, %p362_p6 }
  0x2f   :  { %p365_p9 = pnand %p364_p8, %p358_p5 }
  0x31   :  { %368 = shalt.err (!%p365_p9)
}
  0x32   :  { %52 = dma.hbm_to_vmem [thread:$0]  %s535_s4, 2048, %s47_s21, [#allocation8], %s399_s8, %s399_s8, %s400_s9  }
  0x33   :  { %391 = dma.done.wait [#allocation5], 256  }
  0x34   :  { %392 = vsyncadd [#allocation5], 4294967040 }
  0x35   :  { %393 = dma.done.wait [#allocation8], 4096  }
  0x36   :  { %394 = vsyncadd [#allocation8], 4294963200  ;;  %v402_v0 = vmov 0.0   ;;  %vm403_vm0 = vmmov 0   ;;  %v68_v1 = vld [vmem:[#allocation7] sm:$0xff]  ;;  %v69_v2 = vld [vmem:[#allocation7 + $0x8] sm:$0xff] }
  0x37   :  { %255 = vmatprep.subr.bf16.mxu0 %v402_v0  ;;  %271 = vmatprep.mubr.msk.bf16.mxu0 %vm403_vm0, %v402_v0  ;;  %v70_v3 = vld [vmem:[#allocation7 + $0x10] sm:$0xff]  ;;  %v84_v4 = vpack.c.bf16 %v69_v2, %v68_v1  ;;  %v71_v5 = vld [vmem:[#allocation7 + $0x18] sm:$0xff]  ;;  %v72_v7 = vld [vmem:[#allocation7 + $0x20] sm:$0xff]  ;;  %s404_s12 = smov [#allocation10]  }
  0x38   :  { %275 = vmatprep.subr.bf16.mxu1 %v402_v0  ;;  %291 = vmatprep.mubr.msk.bf16.mxu1 %vm403_vm0, %v402_v0  ;;  %v85_v6 = vpack.c.bf16 %v71_v5, %v70_v3  ;;  %v73_v8 = vld [vmem:[#allocation7 + $0x28] sm:$0xff]  ;;  %v92_v9 = vld [vmem:[#allocation9] sm:$0xff]  ;;  %v94_v11 = vld [vmem:[#allocation9 + $0x10] sm:$0xff]  ;;  %s222_s13 = sshll.u32 %s404_s12, 4  ;;  %s223_s13 = int_to_ptr.vmem [resolvable:$true] %s222_s13 }
  0x39   :  { %256 = vmatpush3.bf16.msra.mxu0 %v84_v4  ;;  %v93_v10 = vld [vmem:[#allocation9 + $0x8] sm:$0xff]  ;;  %v86_v12 = vpack.c.bf16 %v73_v8, %v72_v7  ;;  %v95_v14 = vld [vmem:[#allocation9 + $0x18] sm:$0xff]  ;;  %v74_v15 = vld [vmem:[#allocation7 + $0x30] sm:$0xff]  ;;  %p374_p11 = scmp.lt.s32.totalorder %s223_s13, %s223_s13 }
  0x3a   :  { %257 = vmatprep.subr.bf16.mxu0 %v402_v0  ;;  %v108_v13 = vpack.c.bf16 %v93_v10, %v92_v9  ;;  %v75_v16 = vld [vmem:[#allocation7 + $0x38] sm:$0xff]  ;;  %v109_v17 = vpack.c.bf16 %v95_v14, %v94_v11  ;;  %v96_v18 = vld [vmem:[#allocation9 + $0x20] sm:$0xff]  ;;  %v97_v19 = vld [vmem:[#allocation9 + $0x28] sm:$0xff] }
  0x3b   :  { %v87_v20 = vpack.c.bf16 %v75_v16, %v74_v15  ;;  %v76_v21 = vld [vmem:[#allocation7 + $0x40] sm:$0xff]  ;;  %v77_v22 = vld [vmem:[#allocation7 + $0x48] sm:$0xff]  ;;  %v110_v23 = vpack.c.bf16 %v97_v19, %v96_v18  ;;  %v98_v24 = vld [vmem:[#allocation9 + $0x30] sm:$0xff] }
  0x3c   :  { %276 = vmatpush3.bf16.msra.mxu1 %v108_v13  ;;  %v99_v25 = vld [vmem:[#allocation9 + $0x38] sm:$0xff]  ;;  %v88_v26 = vpack.c.bf16 %v77_v22, %v76_v21  ;;  %v78_v27 = vld [vmem:[#allocation7 + $0x50] sm:$0xff]  ;;  %v100_v30 = vld [vmem:[#allocation9 + $0x40] sm:$0xff] }
  0x3d   :  { %258 = vmatpush3.bf16.msra.mxu0 %v85_v6  ;;  %277 = vmatprep.subr.bf16.mxu1 %v402_v0  ;;  %v79_v28 = vld [vmem:[#allocation7 + $0x58] sm:$0xff]  ;;  %v111_v29 = vpack.c.bf16 %v99_v25, %v98_v24  ;;  %v101_v31 = vld [vmem:[#allocation9 + $0x48] sm:$0xff]  ;;  %v80_v33 = vld [vmem:[#allocation7 + $0x60] sm:$0xff] }
  0x3e   :  { %259 = vmatprep.subr.bf16.mxu0 %v402_v0  ;;  %v89_v32 = vpack.c.bf16 %v79_v28, %v78_v27  ;;  %v81_v34 = vld [vmem:[#allocation7 + $0x68] sm:$0xff]  ;;  %v112_v35 = vpack.c.bf16 %v101_v31, %v100_v30  ;;  %v102_v36 = vld [vmem:[#allocation9 + $0x50] sm:$0xff]  ;;  %v103_v37 = vld [vmem:[#allocation9 + $0x58] sm:$0xff] }
  0x3f   :  { %v90_v38 = vpack.c.bf16 %v81_v34, %v80_v33  ;;  %v82_v39 = vld [vmem:[#allocation7 + $0x70] sm:$0xff]  ;;  %v83_v40 = vld [vmem:[#allocation7 + $0x78] sm:$0xff]  ;;  %v113_v41 = vpack.c.bf16 %v103_v37, %v102_v36  ;;  %v104_v46 = vld [vmem:[#allocation9 + $0x60] sm:$0xff] }
  0x40   :  { %278 = vmatpush3.bf16.msra.mxu1 %v109_v17  ;;  %v91_v42 = vpack.c.bf16 %v83_v40, %v82_v39  ;;  %v65_v43 = vld [vmem:[#allocation4] sm:$0xff]  ;;  %v66_v44 = vld [vmem:[#allocation4 + $0x8] sm:$0xff]  ;;  %v105_v47 = vld [vmem:[#allocation9 + $0x68] sm:$0xff] }
  0x41   :  { %260 = vmatpush3.bf16.msra.mxu0 %v86_v12  ;;  %279 = vmatprep.subr.bf16.mxu1 %v402_v0  ;;  %v67_v45 = vpack.c.bf16 %v66_v44, %v65_v43  ;;  %v114_v48 = vpack.c.bf16 %v105_v47, %v104_v46  ;;  %v106_v49 = vld [vmem:[#allocation9 + $0x70] sm:$0xff]  ;;  %v107_v50 = vld [vmem:[#allocation9 + $0x78] sm:$0xff] }
  0x42   :  { %261 = vmatprep.subr.bf16.mxu0 %v402_v0  ;;  %v115_v51 = vpack.c.bf16 %v107_v50, %v106_v49  ;;  %v235_v52 = vld [vmem:[%s534_s3] ss:$0 sm:$0xff]  ;;  %s369_s3 = scalar_lea.vmem %s223_s13, 256 }
  0x43   :  { %v236_v62 = vld [vmem:[%s536_s5] ss:$0 sm:$0xff]  ;;  %p370_p10 = scmp.ne.s32.totalorder %s223_s13, %s369_s3  ;;  %p375_p12 = scmp.lt.s32.totalorder %s369_s3, %s369_s3 }
  0x44   :  { %280 = vmatpush3.bf16.msra.mxu1 %v110_v23 }
  0x45   :  { %262 = vmatpush3.bf16.msra.mxu0 %v87_v20  ;;  %281 = vmatprep.subr.bf16.mxu1 %v402_v0  ;;  %p376_p13 = por %p375_p12, %p374_p11 }
  0x46   :  { %263 = vmatprep.subr.bf16.mxu0 %v402_v0 }
  0x47   :  { %p377_p0 = pnand %p376_p13, %p370_p10 }
  0x48   :  { %282 = vmatpush3.bf16.msra.mxu1 %v111_v29 }
  0x49   :  { %264 = vmatpush3.bf16.msra.mxu0 %v88_v26  ;;  %283 = vmatprep.subr.bf16.mxu1 %v402_v0 }
  0x4a   :  { %265 = vmatprep.subr.bf16.mxu0 %v402_v0 }
  0x4c   :  { %284 = vmatpush3.bf16.msra.mxu1 %v112_v35 }
  0x4d   :  { %266 = vmatpush3.bf16.msra.mxu0 %v89_v32  ;;  %285 = vmatprep.subr.bf16.mxu1 %v402_v0 }
  0x4e   :  { %267 = vmatprep.subr.bf16.mxu0 %v402_v0 }
  0x50   :  { %286 = vmatpush3.bf16.msra.mxu1 %v113_v41 }
  0x51   :  { %268 = vmatpush3.bf16.msra.mxu0 %v90_v38  ;;  %287 = vmatprep.subr.bf16.mxu1 %v402_v0 }
  0x52   :  { %269 = vmatprep.subr.bf16.mxu0 %v402_v0 }
  0x54   :  { %288 = vmatpush3.bf16.msra.mxu1 %v114_v48 }
  0x55   :  { %270 = vmatpush3.bf16.msra.mxu0 %v91_v42  ;;  %289 = vmatprep.subr.bf16.mxu1 %v402_v0 }
  0x58   :  { %272 = vmatmul.mubr.bf16.vlgmr.msra.gmra.mrb[0].mxu0 %v67_v45  ;;  %290 = vmatpush3.bf16.msra.mxu1 %v115_v51 }
 0x12b   :  { %v158_v53 = vpop.f32.mrb[0].mxu0 }
 0x12c   :  { %v159_v54 = vadd.f32 %v235_v52, %v158_v53  ;;  %v273_v55 = vpop.f32.mrb[1].mxu0 }
 0x12d   :  { %v161_v56 = vpop.f32.mrb[2].mxu0 }
 0x12e   :  { %v162_v57 = vadd.f32 %v235_v52, %v161_v56  ;;  %v274_v58 = vpop.f32.mrb[3].mxu0  ;;  %v165_v59 = vmax.f32 %v159_v54, 0.0 }
 0x130   :  { %v166_v60 = vmax.f32 %v162_v57, 0.0 }
 0x132   :  { %v167_v61 = vpack.c.bf16 %v166_v60, %v165_v59 }
 0x134   :  { %292 = vmatmul.mubr.bf16.vlgmr.msra.gmra.mrb[0].mxu1 %v167_v61 }
 0x207   :  { %v208_v63 = vpop.f32.mrb[0].mxu1 }
 0x208   :  { %v209_v0 = vadd.f32 %v236_v62, %v208_v63  ;;  %v293_v1 = vpop.f32.mrb[1].mxu1 }
 0x209   :  { %v211_v2 = vpop.f32.mrb[2].mxu1 }
 0x20a   :  { %215 = vst [vmem:[#allocation10] sm:$0xff] %v209_v0  ;;  %v212_v3 = vadd.f32 %v236_v62, %v211_v2  ;;  %v294_v4 = vpop.f32.mrb[3].mxu1 }
 0x20c   :  { %216 = vst [vmem:[#allocation10 + $0x8] sm:$0xff] %v212_v3 }
 0x20d   :  { %380 = shalt.err (!%p377_p0)
}
 0x20e   :  { %s381_s15 = scalar_lea.hbm %s537_s6, 256 }
 0x20f   :  { %p382_p1 = scmp.ne.s32.totalorder %s537_s6, %s381_s15  ;;  %p385_p2 = scmp.lt.u32.totalorder %s381_s15, %s537_s6 }
 0x211   :  { %p387_p3 = pnand %p385_p2, %p382_p1 }
 0x213   :  { %390 = shalt.err (!%p387_p3)
}
 0x214   :  { %228 = dma.vmem_to_hbm [thread:$0]  %s223_s13, 256, %s537_s6, [#allocation6], %s399_s8, %s399_s8, %s400_s9  }
 0x215   :  { %395 = dma.done.wait [#allocation6], 256  }
 0x216   :  { %396 = vsyncadd [#allocation6], 4294967040 }
 0x217   :  { %232 = vsyncpa [#allocation5], 1 }
 0x218   :  { %233 = vsyncpa [#allocation8], 1 }
 0x219   :  { %234 = vsyncpa [#allocation6], 1 }

</bundles_post_ra>
